<compile_context>
chip_gen: v7x
topology: tpu7x:2x2x1
jax: 0.10.0
libtpu: 0.0.40
codegen_flags: <defaults>
</compile_context>

<pallas_src>
import numpy as np
import jax
import jax.numpy as jnp
from jax.experimental import pallas as pl
from jax.experimental.pallas import tpu as pltpu


def _round_up(v: int, m: int) -> int:
    return (v + m - 1) // m * m


def _sheaf_maps_kernel(idx_ref, bd_ref, t_ref, o_ref):
    """One edge tile, lane-dense layout (edges on the 128-lane axis).

    idx_ref: (2, tE)   int32  -- [row ; col + N] node ids for this edge tile
    bd_ref : (Dp, 2N)  f32    -- blockdiag(x^T, x^T), rows zero-padded to Dp
    t_ref  : (K*Dp, Dp) f32   -- parameter, zero-padded per map, flattened
    o_ref  : (K, tE)   f32    -- tanh(z_e^T T_k z_e)
    """
    K, tE = o_ref.shape
    Dp, M2 = bd_ref.shape

    idx = idx_ref[...]                                           # (2, tE) int32
    node_ids = jax.lax.broadcasted_iota(jnp.int32, (M2, tE), 0)  # (2N, tE)
    # "two-hot" selector: column e has a 1 at row[e] and at N + col[e].
    sel = jnp.logical_or(node_ids == idx[0:1, :],
                         node_ids == idx[1:2, :]).astype(jnp.float32)

    # Fused gather + concat + transpose as a single MXU matmul:
    #   zt[:, e] = [x[row_e] ; x[col_e] ; 0-pad]        (Dp, tE)
    zt = jnp.dot(bd_ref[...], sel, preferred_element_type=jnp.float32)

    # All K quadratic forms in ONE fused MXU matmul:
    #   w[k*Dp + i, e] = (T_k z_e)_i                    (K*Dp, tE)
    w = jnp.dot(t_ref[...], zt, preferred_element_type=jnp.float32)

    # maps[k, e] = sum_i z[e, i] * (T_k z_e)_i  -- sublane reduce, lane-dense.
    # Dp is a multiple of 8 so the reshape is layout preserving.
    maps = jnp.sum(w.reshape(K, Dp, tE) * zt[None, :, :], axis=1)   # (K, tE)
    o_ref[...] = jnp.tanh(maps)


def quadratic_form_sheaf_maps(x, edge_index, tensor, *, max_tile_e: int = 16384,
                              vmem_budget_bytes: int = 10 << 20):
    """x: (N, F) f32, edge_index: (2, E) int, tensor: (K, 2F, 2F) f32
    -> (E, K) f32 = tanh(z_e^T T_k z_e), z_e = [x[row_e] || x[col_e]]."""
    x = x.astype(jnp.float32)
    tensor = tensor.astype(jnp.float32)
    N, F = x.shape
    D = 2 * F
    K = tensor.shape[0]
    if tensor.shape != (K, D, D):
        raise ValueError(f"tensor shape {tensor.shape} incompatible with 2*F={D}")
    E = int(edge_index.shape[1])

    Dp = _round_up(D, 8)          # sublane-align the quadratic-form dimension
    M2 = 2 * N

    # blockdiag(x^T, x^T) with rows zero-padded to Dp.  N*F is tiny, so this
    # stays VMEM-resident across all grid steps (constant index map).
    # TODO(synk): for very large N the (2N, tile) two-hot selector dominates
    # VMEM; such graphs need a DMA/dynamic-gather path instead.
    bd = jnp.zeros((Dp, M2), jnp.float32)
    bd = bd.at[:F, :N].set(x.T)
    bd = bd.at[F:D, N:].set(x.T)

    # Parameter zero-padded per map to (Dp, Dp) and flattened to (K*Dp, Dp).
    # TODO(synk): for large K*D split K onto a second ("arbitrary") grid axis
    # to keep the (K*Dp, tile) intermediate inside VMEM; unnecessary here.
    t2p = jnp.pad(tensor, ((0, 0), (0, Dp - D), (0, Dp - D))).reshape(K * Dp, Dp)

    # --- edge-tile size from a VMEM budget (amortizes ~0.35us/step overhead) ---
    # Per-column f32 bytes: idx (2, double-buffered) + selector (2N) + zt (Dp)
    # + matmul output & product intermediate (2*K*Dp) + output (K, dbl-buffered).
    param_bytes = 4 * 2 * (bd.size + t2p.size)      # resident inputs, dbl-buffered
    col_budget = max(vmem_budget_bytes - param_bytes, 1 << 20)
    bytes_per_col = 4 * (2 * 2 + M2 + Dp + 2 * K * Dp + 2 * K)
    tile = max(128, (col_budget // bytes_per_col) // 128 * 128)
    tile = min(tile, max_tile_e, _round_up(max(E, 1), 128))
    E_pad = _round_up(max(E, 1), tile)

    # Edge ids: [row ; col + N].  Padded columns point at node 0 (finite values,
    # sliced off below).  This is the ONLY per-edge HBM input (8 bytes/edge).
    row = edge_index[0].astype(jnp.int32)
    col = edge_index[1].astype(jnp.int32) + N
    idx = jnp.pad(jnp.stack([row, col], axis=0), ((0, 0), (0, E_pad - E)))

    out = pl.pallas_call(
        _sheaf_maps_kernel,
        out_shape=jax.ShapeDtypeStruct((K, E_pad), jnp.float32),
        grid_spec=pltpu.PrefetchScalarGridSpec(
            num_scalar_prefetch=0,
            grid=(E_pad // tile,),
            in_specs=[
                pl.BlockSpec((2, tile), lambda i: (0, i)),      # edge ids
                pl.BlockSpec((Dp, M2), lambda i: (0, 0)),       # node features (resident)
                pl.BlockSpec((K * Dp, Dp), lambda i: (0, 0)),   # parameter (resident)
            ],
            out_specs=pl.BlockSpec((K, tile), lambda i: (0, i)),
        ),
        # Independent edge tiles -> shard across TensorCores where available.
        compiler_params=pltpu.CompilerParams(
            dimension_semantics=("parallel",)),
    )(idx, bd, t2p)

    # (K, E) -> (E, K): K*E*4 bytes, negligible next to the kernel's traffic.
    return out[:, :E].T


class QuadraticFormSheafLearner:
    """JAX/Pallas port.  `in_channels` is the concatenated edge-feature dim
    (== 2 * node feature dim), matching the (K, in_ch, in_ch) parameter shape
    of the reference __init__."""

    def __init__(self, in_channels: int, out_shape):
        assert len(out_shape) in (1, 2)
        self.out_shape = tuple(out_shape)
        K = int(np.prod(out_shape))
        # Deterministic init, exactly as the PyTorch __init__:
        # eye(in_channels) tiled K times -> (K, in_channels, in_channels).
        self.tensor = jnp.tile(
            jnp.eye(in_channels, dtype=jnp.float32)[None], (K, 1, 1))

    def __call__(self, x, edge_index):
        # TODO(synk): `map_builder` is undefined in the reference module; the
        # quadratic form tanh(z^T T_k z) is the assumed semantics (same
        # contract as the previously validated revision).
        maps = quadratic_form_sheaf_maps(x, edge_index, self.tensor)   # (E, K)
        if len(self.out_shape) == 2:
            return maps.reshape(-1, self.out_shape[0], self.out_shape[1])
        return maps.reshape(-1, self.out_shape[0])


if __name__ == "__main__":
    key = jax.random.PRNGKey(0)
    k_x, k_row, k_col, k_t, k_x2, k_r2, k_c2 = jax.random.split(key, 7)

    # ---- test 1: the module (identity-initialized parameter) ----
    N, F, E = 16, 8, 40                 # nodes, node-feature dim, edges
    d = 2                               # sheaf map is d x d  -> K = 4
    D = 2 * F

    x = (0.1 * jax.random.normal(k_x, (N, F))).astype(jnp.float32)
    row = jax.random.randint(k_row, (E,), 0, N, dtype=jnp.int32)
    col = jax.random.randint(k_col, (E,), 0, N, dtype=jnp.int32)
    edge_index = jnp.stack([row, col], axis=0)                  # (2, E) int32

    learner = QuadraticFormSheafLearner(in_channels=D, out_shape=(d, d))
    out = jax.block_until_ready(learner(x, edge_index))
    assert out.shape == (E, d, d), out.shape

    x_np = np.asarray(x, dtype=np.float64)
    z = np.concatenate([x_np[np.asarray(row)], x_np[np.asarray(col)]], axis=1)
    t_np = np.asarray(learner.tensor, dtype=np.float64)
    ref = np.tanh(np.einsum("ei,kij,ej->ek", z, t_np, z)).reshape(E, d, d)
    np.testing.assert_allclose(np.asarray(out), ref, rtol=1e-5, atol=1e-5)

    # ---- test 2: random parameter + non-8-aligned D (exercises Dp padding) ----
    N2, F2, E2, K2 = 12, 5, 300, 3
    D2 = 2 * F2                          # 10, not a multiple of 8
    x2 = (0.2 * jax.random.normal(k_x2, (N2, F2))).astype(jnp.float32)
    t2 = (0.5 * jax.random.normal(k_t, (K2, D2, D2))).astype(jnp.float32)
    row2 = jax.random.randint(k_r2, (E2,), 0, N2, dtype=jnp.int32)
    col2 = jax.random.randint(k_c2, (E2,), 0, N2, dtype=jnp.int32)
    ei2 = jnp.stack([row2, col2], axis=0)

    maps2 = jax.block_until_ready(quadratic_form_sheaf_maps(x2, ei2, t2))
    x2_np = np.asarray(x2, dtype=np.float64)
    z2 = np.concatenate([x2_np[np.asarray(row2)], x2_np[np.asarray(col2)]], axis=1)
    ref2 = np.tanh(np.einsum("ei,kij,ej->ek", z2, np.asarray(t2, np.float64), z2))
    np.testing.assert_allclose(np.asarray(maps2), ref2, rtol=1e-4, atol=1e-5)

    print("KERNEL_OK")
</pallas_src>

<mosaic_0001>
module attributes {stable_mosaic.version = 11 : i64} {
  func.func @_sheaf_maps_kernel(%arg0: i32, %arg1: memref<2x128xi32, #tpu.memory_space<vmem>>, %arg2: memref<16x32xf32, #tpu.memory_space<vmem>>, %arg3: memref<64x16xf32, #tpu.memory_space<vmem>>, %arg4: memref<4x128xf32, #tpu.memory_space<vmem>>) attributes {dimension_semantics = [#tpu.dimension_semantics<parallel>], iteration_bounds = array<i64: 1>, scalar_prefetch = 0 : i64, scratch_operands = 0 : i64, tpu.core_type = #tpu.core_type<tc>, window_params = [{transform_indices = @transform_0, window_bounds = array<i64: 2, 128>}, {pipeline_mode = #tpu.pipeline_mode<synchronous>, transform_indices = @transform_1, window_bounds = array<i64: 16, 32>}, {pipeline_mode = #tpu.pipeline_mode<synchronous>, transform_indices = @transform_2, window_bounds = array<i64: 64, 16>}, {transform_indices = @transform_3, window_bounds = array<i64: 4, 128>}]} {
    %c0 = arith.constant 0 : index
    %c0_0 = arith.constant 0 : index
    %0 = vector.load %arg1[%c0, %c0_0] : memref<2x128xi32, #tpu.memory_space<vmem>>, vector<2x128xi32>
    %1 = tpu.iota {dimensions = array<i32: 0>} : vector<32x128xi32>
    %2 = vector.extract_strided_slice %0 {offsets = [0, 0], sizes = [1, 128], strides = [1, 1]} : vector<2x128xi32> to vector<1x128xi32>
    %3 = vector.broadcast %2 : vector<1x128xi32> to vector<32x128xi32>
    %4 = arith.cmpi eq, %1, %3 : vector<32x128xi32>
    %5 = vector.extract_strided_slice %0 {offsets = [1, 0], sizes = [1, 128], strides = [1, 1]} : vector<2x128xi32> to vector<1x128xi32>
    %6 = vector.broadcast %5 : vector<1x128xi32> to vector<32x128xi32>
    %7 = arith.cmpi eq, %1, %6 : vector<32x128xi32>
    %8 = arith.ori %4, %7 : vector<32x128xi1>
    %9 = arith.extui %8 : vector<32x128xi1> to vector<32x128xi32>
    %10 = arith.sitofp %9 : vector<32x128xi32> to vector<32x128xf32>
    %c0_1 = arith.constant 0 : index
    %c0_2 = arith.constant 0 : index
    %11 = vector.load %arg2[%c0_1, %c0_2] : memref<16x32xf32, #tpu.memory_space<vmem>>, vector<16x32xf32>
    %cst = arith.constant dense<0.000000e+00> : vector<16x128xf32>
    %12 = tpu.matmul %11, %10, %cst {dimension_numbers = #tpu.dot_dimension_numbers<[1], [0], [0], [1], [0, 0, 1, 1], [], []>} : vector<16x32xf32>, vector<32x128xf32>, vector<16x128xf32> -> vector<16x128xf32>
    %c0_3 = arith.constant 0 : index
    %c0_4 = arith.constant 0 : index
    %13 = vector.load %arg3[%c0_3, %c0_4] : memref<64x16xf32, #tpu.memory_space<vmem>>, vector<64x16xf32>
    %cst_5 = arith.constant dense<0.000000e+00> : vector<64x128xf32>
    %14 = tpu.matmul %13, %12, %cst_5 {dimension_numbers = #tpu.dot_dimension_numbers<[1], [0], [0], [1], [0, 0, 1, 1], [], []>} : vector<64x16xf32>, vector<16x128xf32>, vector<64x128xf32> -> vector<64x128xf32>
    %15 = vector.shape_cast %14 : vector<64x128xf32> to vector<4x16x128xf32>
    %16 = vector.shape_cast %12 : vector<16x128xf32> to vector<1x16x128xf32>
    %17 = vector.broadcast %16 : vector<1x16x128xf32> to vector<4x16x128xf32>
    %18 = arith.mulf %15, %17 : vector<4x16x128xf32>
    %cst_6 = arith.constant dense<0.000000e+00> : vector<4x128xf32>
    %19 = vector.multi_reduction <add>, %18, %cst_6 [1] : vector<4x16x128xf32> to vector<4x128xf32>
    %20 = math.tanh %19 : vector<4x128xf32>
    %c0_7 = arith.constant 0 : index
    %c0_8 = arith.constant 0 : index
    %21 = vector.load %arg4[%c0_7, %c0_8] : memref<4x128xf32, #tpu.memory_space<vmem>>, vector<4x128xf32>
    tpu.vector_store %arg4[%c0_7, %c0_8], %20 {strides = array<i32>} : memref<4x128xf32, #tpu.memory_space<vmem>>, vector<4x128xf32>,
    return
  }
  func.func @transform_0(%arg0: i32) -> (i32, i32) {
    %c0_i32 = arith.constant 0 : i32
    %c0_i32_0 = arith.constant 0 : i32
    return %c0_i32, %arg0 : i32, i32
  }
  func.func @transform_1(%arg0: i32) -> (i32, i32) {
    %c0_i32 = arith.constant 0 : i32
    %c0_i32_0 = arith.constant 0 : i32
    %c0_i32_1 = arith.constant 0 : i32
    return %c0_i32, %c0_i32_0 : i32, i32
  }
  func.func @transform_2(%arg0: i32) -> (i32, i32) {
    %c0_i32 = arith.constant 0 : i32
    %c0_i32_0 = arith.constant 0 : i32
    %c0_i32_1 = arith.constant 0 : i32
    return %c0_i32, %c0_i32_0 : i32, i32
  }
  func.func @transform_3(%arg0: i32) -> (i32, i32) {
    %c0_i32 = arith.constant 0 : i32
    %c0_i32_0 = arith.constant 0 : i32
    return %c0_i32, %arg0 : i32, i32
  }
}

</mosaic_0001>

<bundles_post_ra>
// kernel: tpu_custom_call.1
= control target key start
LH: loop header
LB: loop body
LE: loop exit
PB: predicated region body
PF: predicated region fallthrough
CT: control target
= control target key end

     0   :  { %v16_v0 = vlaneseq  ;;  %vm51_vm0 = vcmask 261120   ;;  %s523_s0 = inlined_call_operand.vmem [shape: s32[2,128], index: 0, kind: input, shape index: {}]   ;;  %s524_s1 = inlined_call_operand.vmem [shape: f32[16,32], index: 1, kind: input, shape index: {}]   ;;  %s525_s2 = inlined_call_operand.vmem [shape: f32[64,16], index: 2, kind: input, shape index: {}]   ;;  %s526_s3 = inlined_call_operand.hbm [shape: f32[4,128], index: 3, kind: output, shape index: {}]  }
   0x1   :  { %v49_v1 = vld [vmem:[%s524_s1] sm:$0xff] }
   0x2   :  { %379 = vmatprep.mubr.msk.f32.mxu0 %vm51_vm0, %v49_v1 }
   0x3   :  { %8 = vsyncpa [#allocation3], 0  ;;  %v17_v2 = vshrl.u32 %v16_v0, 7  ;;  %v15_v3 = vld [vmem:[%s523_s0] sm:$0x3]  ;;  %v50_v12 = vld [vmem:[%s524_s1 + $0x8] sm:$0xff] }
   0x4   :  { %v446_v11 = vmov 1.0|1.0   ;;  %v133_v13 = vld [vmem:[%s525_s2] sm:$0xff]  ;;  %vm141_vm15 = vcmask 130048   ;;  %v135_v14 = vld [vmem:[%s525_s2 + $0x10] sm:$0xff]  ;;  %v134_v18 = vld [vmem:[%s525_s2 + $0x8] sm:$0xff] }
   0x5   :  { %v18_v4 = vadd.s32 8, %v17_v2  ;;  %v23_v5 = vsub.s32 0, %v17_v2  ;;  %v31_v6 = vsub.s32 1, %v17_v2  ;;  %v19_v7 = vadd.s32 16, %v17_v2  ;;  %389 = vmatprep.mubr.msk.f32.mxu1 %vm141_vm15, %v135_v14  ;;  %v136_v19 = vld [vmem:[%s525_s2 + $0x18] sm:$0xff]  ;;  %v137_v20 = vld [vmem:[%s525_s2 + $0x20] sm:$0xff] }
   0x6   :  { %v20_v10 = vadd.s32 24, %v17_v2  ;;  %v138_v21 = vld [vmem:[%s525_s2 + $0x28] sm:$0xff]  ;;  %v139_v22 = vld [vmem:[%s525_s2 + $0x30] sm:$0xff]  ;;  %v140_v23 = vld [vmem:[%s525_s2 + $0x38] sm:$0xff]  ;;  %s447_s2 = smov [#allocation2]  }
   0x7   :  { %v24_v8 = vrot.slane %v15_v3, %v23_v5  ;;  %v32_v9 = vrot.slane %v15_v3, %v31_v6  ;;  %s329_s5 = sshll.u32 %s447_s2, 4  ;;  %s330_s5 = int_to_ptr.vmem [resolvable:$true] %s329_s5 }
   0x8   :  { %s422_s6 = scalar_lea.vmem %s330_s5, 64  ;;  %p427_p1 = scmp.lt.s32.totalorder %s330_s5, %s330_s5 }
   0x9   :  { %vm25_vm1 = vcmp.eq.s32.totalorder %v17_v2, %v24_v8  ;;  %vm26_vm2 = vcmp.eq.s32.totalorder %v18_v4, %v24_v8  ;;  %vm33_vm3 = vcmp.eq.s32.totalorder %v17_v2, %v32_v9  ;;  %vm34_vm4 = vcmp.eq.s32.totalorder %v18_v4, %v32_v9  ;;  %p423_p0 = scmp.ne.s32.totalorder %s330_s5, %s422_s6  ;;  %p428_p2 = scmp.lt.s32.totalorder %s422_s6, %s422_s6 }
   0xa   :  { %vm37_vm5 = vmor %vm25_vm1, %vm33_vm3  ;;  %vm27_vm6 = vcmp.eq.s32.totalorder %v19_v7, %v24_v8  ;;  %vm35_vm7 = vcmp.eq.s32.totalorder %v19_v7, %v32_v9  ;;  %vm28_vm9 = vcmp.eq.s32.totalorder %v20_v10, %v24_v8  ;;  %vm36_vm10 = vcmp.eq.s32.totalorder %v20_v10, %v32_v9 }
   0xb   :  { %vm38_vm8 = vmor %vm26_vm2, %vm34_vm4  ;;  %vm317_vm1 = vcmask 1042434   ;;  %vm319_vm2 = vcmask 1043459   ;;  %p429_p3 = por %p428_p2, %p427_p1 }
   0xc   :  { %vm398_vm11 = vmpackc.low %vm38_vm8, %vm37_vm5 }
   0xd   :  { %399 = vmatprep.subr.msk.bf16.mxu0 %vm398_vm11, %v446_v11  ;;  %vm39_vm12 = vmor %vm27_vm6, %vm35_vm7  ;;  %p430_p4 = pnand %p429_p3, %p423_p0 }
   0xe   :  { %401 = vmatpush3.bf16.msk.msra.mxu0 %vm398_vm11, %v446_v11  ;;  %vm40_vm13 = vmor %vm28_vm9, %vm36_vm10 }
   0xf   :  { %vm402_vm14 = vmpackc.low %vm40_vm13, %vm39_vm12 }
  0x10   :  { %403 = vmatprep.subr.msk.bf16.mxu0 %vm402_vm14, %v446_v11 }
  0x12   :  { %405 = vmatpush3.bf16.msk.msra.mxu0 %vm402_vm14, %v446_v11 }
  0x15   :  { %380 = vmatmul.mubr.msk.f32.vlgmr.msra.gmra.mrb[0].mxu0 %vm51_vm0, %v50_v12  ;;  %vm315_vm0 = vcmask 1041409  }
  0x16   :  { %386 = vmatprep.mubr.msk.f32.mxu0 %vm141_vm15, %v133_v13 }
  0xe8   :  { %v381_v15 = vpop.f32.mrb[0].mxu0 }
  0xe9   :  { %v124_v16 = vpop.f32.mrb[1].mxu0 }
  0xea   :  { %v406_v17 = vpack.c.bf16 %v381_v15, %v124_v16 }
  0xec   :  { %407 = vmatprep.subr.bf16.mxu0 %v406_v17  ;;  %410 = vmatprep.subr.bf16.mxu1 %v406_v17 }
  0xed   :  { %409 = vmatpush3.bf16.msra.mxu0 %v406_v17  ;;  %411 = vmatpush3.bf16.msra.mxu1 %v406_v17 }
  0xf0   :  { %387 = vmatmul.mubr.msk.f32.vlgmr.msra.gmra.mrb[2].mxu0 %vm141_vm15, %v134_v18  ;;  %390 = vmatmul.mubr.msk.f32.vlgmr.msra.gmra.mrb[0].mxu1 %vm141_vm15, %v136_v19 }
  0xf1   :  { %392 = vmatprep.mubr.msk.f32.mxu1 %vm141_vm15, %v137_v20 }
  0xf4   :  { %393 = vmatmul.mubr.msk.f32.gmra.mrb[2].mxu1 %vm141_vm15, %v138_v21 }
  0xf5   :  { %395 = vmatprep.mubr.msk.f32.mxu1 %vm141_vm15, %v139_v22 }
  0xf8   :  { %396 = vmatmul.mubr.msk.f32.gmra.mrb[4].mxu1 %vm141_vm15, %v140_v23 }
 0x1c3   :  { %v388_v24 = vpop.f32.mrb[2].mxu0  ;;  %v391_v25 = vpop.f32.mrb[0].mxu1 }
 0x1c4   :  { %v272_v26 = vmul.f32 %v388_v24, %v381_v15  ;;  %v274_v27 = vmul.f32 %v391_v25, %v381_v15  ;;  %v232_v28 = vpop.f32.mrb[3].mxu0  ;;  %v242_v29 = vpop.f32.mrb[1].mxu1 }
 0x1c5   :  { %v271_v30 = vmul.f32 %v232_v28, %v124_v16  ;;  %v273_v31 = vmul.f32 %v242_v29, %v124_v16 }
 0x1c7   :  { %v279_v32 = vadd.f32 %v272_v26, %v271_v30  ;;  %v286_v33 = vadd.f32 %v274_v27, %v273_v31  ;;  %v394_v34 = vpop.f32.mrb[2].mxu1 }
 0x1c8   :  { %v276_v35 = vmul.f32 %v394_v34, %v381_v15  ;;  %v252_v36 = vpop.f32.mrb[3].mxu1 }
 0x1c9   :  { %v280_v37 = vrot.slane %v279_v32, 4  ;;  %v287_v38 = vrot.slane %v286_v33, 4  ;;  %v275_v39 = vmul.f32 %v252_v36, %v124_v16 }
 0x1cb   :  { %v281_v40 = vadd.f32 %v280_v37, %v279_v32  ;;  %v288_v41 = vadd.f32 %v287_v38, %v286_v33  ;;  %v293_v42 = vadd.f32 %v276_v35, %v275_v39  ;;  %v397_v43 = vpop.f32.mrb[4].mxu1 }
 0x1cc   :  { %v278_v44 = vmul.f32 %v397_v43, %v381_v15  ;;  %v262_v45 = vpop.f32.mrb[5].mxu1 }
 0x1cd   :  { %v282_v46 = vrot.slane %v281_v40, 2  ;;  %v289_v47 = vrot.slane %v288_v41, 2  ;;  %v294_v48 = vrot.slane %v293_v42, 4  ;;  %v277_v49 = vmul.f32 %v262_v45, %v124_v16 }
 0x1cf   :  { %v283_v50 = vadd.f32 %v282_v46, %v281_v40  ;;  %v290_v51 = vadd.f32 %v289_v47, %v288_v41  ;;  %v295_v52 = vadd.f32 %v294_v48, %v293_v42  ;;  %v300_v53 = vadd.f32 %v278_v44, %v277_v49 }
 0x1d1   :  { %v284_v54 = vrot.slane %v283_v50, 1  ;;  %v291_v55 = vrot.slane %v290_v51, 1  ;;  %v296_v56 = vrot.slane %v295_v52, 2  ;;  %v301_v57 = vrot.slane %v300_v53, 4 }
 0x1d3   :  { %v285_v58 = vadd.f32 %v284_v54, %v283_v50  ;;  %v292_v59 = vadd.f32 %v291_v55, %v290_v51  ;;  %v297_v60 = vadd.f32 %v296_v56, %v295_v52  ;;  %v302_v61 = vadd.f32 %v301_v57, %v300_v53 }
 0x1d5   :  { %414 = vtanh.f32 %v285_v58  ;;  %v298_v62 = vrot.slane %v297_v60, 1  ;;  %v303_v63 = vrot.slane %v302_v61, 2 }
 0x1d6   :  { %416 = vtanh.f32 %v292_v59 }
 0x1d7   :  { %v299_v0 = vadd.f32 %v298_v62, %v297_v60  ;;  %v304_v1 = vadd.f32 %v303_v63, %v302_v61 }
 0x1d9   :  { %418 = vtanh.f32 %v299_v0  ;;  %v305_v2 = vrot.slane %v304_v1, 1 }
 0x1db   :  { %v306_v3 = vadd.f32 %v305_v2, %v304_v1 }
 0x1dd   :  { %420 = vtanh.f32 %v306_v3 }
 0x1df   :  { %v415_v4 = vpop.eup %414 }
 0x1e0   :  { %v417_v5 = vpop.eup %416 }
 0x1e1   :  { %v316_v6 = vsel %vm315_vm0, %v417_v5, %v415_v4 }
 0x1e3   :  { %v419_v7 = vpop.eup %418 }
 0x1e4   :  { %v318_v8 = vsel %vm317_vm1, %v419_v7, %v316_v6 }
 0x1e7   :  { %v421_v9 = vpop.eup %420 }
 0x1e8   :  { %v320_v10 = vsel %vm319_vm2, %v421_v9, %v318_v8 }
 0x1e9   :  { %322 = vst [vmem:[#allocation2] sm:$0xf] %v320_v10 }
 0x1ea   :  { %433 = shalt.err (!%p430_p4)
}
 0x1eb   :  { %s434_s9 = scalar_lea.hbm %s526_s3, 64 }
 0x1ec   :  { %p435_p5 = scmp.ne.s32.totalorder %s526_s3, %s434_s9  ;;  %p438_p6 = scmp.lt.u32.totalorder %s434_s9, %s526_s3 }
 0x1ee   :  { %p440_p7 = pnand %p438_p6, %p435_p5 }
 0x1f0   :  { %443 = shalt.err (!%p440_p7)
}
 0x1f1   :  { %332 = dma.vmem_to_hbm [thread:$0]  %s330_s5, 64, %s526_s3, [#allocation3]  }
 0x1f2   :  { %444 = dma.done.wait [#allocation3], 64  }
 0x1f3   :  { %445 = vsyncadd [#allocation3], 4294967232 }
 0x1f4   :  { %336 = vsyncpa [#allocation3], 1 }

</bundles_post_ra>
